<compile_context>
chip_gen: v7x
topology: tpu7x:2x2x1
jax: 0.10.0
libtpu: 0.0.40
codegen_flags: <defaults>
</compile_context>

<pallas_src>
from functools import partial

import jax
import jax.numpy as jnp
from jax import lax
from jax.experimental import pallas as pl
from jax.experimental.pallas import tpu as pltpu


# ---------------------------------------------------------------------------
# Kernels
# ---------------------------------------------------------------------------

def _hidden_kernel(w_ref, x_ref, h_ref):
    # h = w @ x.  x arrives f32; cast the block to bf16 in-kernel (VPU cast is
    # hidden under the DMA) so the wrapper never does a separate pass over x.
    xb = x_ref[...].astype(jnp.bfloat16)                        # (n, tk)
    h = jnp.dot(w_ref[...], xb, preferred_element_type=jnp.float32)
    h_ref[...] = h.astype(h_ref.dtype)


def _forward_kernel(w_ref, x_ref, b_ref, o_ref):
    w = w_ref[...]                                              # (m, n) bf16
    xb = x_ref[...].astype(jnp.bfloat16)                        # (n, tk)
    h = jnp.dot(w, xb, preferred_element_type=jnp.float32)      # (m, tk) f32
    # out = w.T @ h without materializing w.T: contract the leading m dims.
    out = lax.dot_general(
        w, h.astype(jnp.bfloat16),
        dimension_numbers=(((0,), (0,)), ((), ())),
        preferred_element_type=jnp.float32)                     # (n, tk) f32
    # Keep bias-add + ReLU in f32 (v5e has no bf16 VALU); cast only at store.
    o_ref[...] = jnp.maximum(out + b_ref[...], 0.0).astype(o_ref.dtype)


def _fused_kernel(w_ref, x_ref, b_ref, h_ref, o_ref):
    # Single pass producing BOTH the hidden state and the ReLU output, so a
    # caller needing both never re-reads x or recomputes w @ x.
    w = w_ref[...]
    xb = x_ref[...].astype(jnp.bfloat16)
    h = jnp.dot(w, xb, preferred_element_type=jnp.float32)
    h_ref[...] = h.astype(h_ref.dtype)
    out = lax.dot_general(
        w, h.astype(jnp.bfloat16),
        dimension_numbers=(((0,), (0,)), ((), ())),
        preferred_element_type=jnp.float32)
    o_ref[...] = jnp.maximum(out + b_ref[...], 0.0).astype(o_ref.dtype)


# ---------------------------------------------------------------------------
# Tiling / compiler-param helpers (trace-time Python)
# ---------------------------------------------------------------------------

def _pick_tk(k, block_k, bytes_per_col):
    """Batch (lane) tile width:
       - multiple of 128 when tiling (unmasked, lane-dense vst),
       - as large as fits a ~24 MiB double-buffered streaming budget,
       - >=2 grid steps when cleanly possible (dual-TC on v7x)."""
    budget = 24 * 1024 * 1024
    cap = max(128, (budget // max(1, 2 * bytes_per_col)) // 128 * 128)
    block_k = max(128, (min(block_k, cap) // 128) * 128)
    if k <= 128 or k % 128 != 0:
        # Small / ragged batch: one full-extent block if it fits, otherwise
        # 128-multiple blocks (Pallas masks the padded tail store).
        return k if k <= block_k else block_k
    tk = min(block_k, k)
    if tk == k and k >= 256 and (k // 2) % 128 == 0:
        tk = k // 2          # split so both v7x TensorCores get a grid step
    return tk


def _compiler_params(vmem_bytes_est):
    limit = None
    if vmem_bytes_est > 12 * 1024 * 1024:       # above v5e's scoped default
        limit = int(min(max(2 * vmem_bytes_est, 32 * 1024 * 1024),
                        56 * 1024 * 1024))
    return pltpu.CompilerParams(dimension_semantics=("parallel",),
                                vmem_limit_bytes=limit)


# ---------------------------------------------------------------------------
# Wrappers
# ---------------------------------------------------------------------------

@partial(jax.jit, static_argnames=("return_hidden_state", "block_k", "out_dtype"))
def toy_model_forward(w, x, b, return_hidden_state=False, block_k=2048,
                      out_dtype=jnp.bfloat16):
    m, n = w.shape
    n2, k = x.shape
    assert n2 == n

    w_bf = w.astype(jnp.bfloat16)            # tiny (m, n): wrapper cast is cheap

    if return_hidden_state:
        per_col = n * 4 + m * 4              # f32 x in + f32 h out, per column
        tk = _pick_tk(k, block_k, per_col)
        grid = (pl.cdiv(k, tk),)
        est = 2 * tk * per_col + m * n * 2
        cost = pl.CostEstimate(
            flops=2 * m * n * k, transcendentals=0,
            bytes_accessed=m * n * 2 + n * k * 4 + m * k * 4)
        return pl.pallas_call(
            _hidden_kernel,
            out_shape=jax.ShapeDtypeStruct((m, k), jnp.float32),
            grid=grid,
            in_specs=[pl.BlockSpec((m, n), lambda i: (0, 0)),      # resident
                      pl.BlockSpec((n, tk), lambda i: (0, i))],    # streamed
            out_specs=pl.BlockSpec((m, tk), lambda i: (0, i)),
            compiler_params=_compiler_params(est),
            cost_estimate=cost,
        )(w_bf, x)

    out_isz = jnp.dtype(out_dtype).itemsize
    per_col = n * 4 + n * out_isz
    tk = _pick_tk(k, block_k, per_col)
    grid = (pl.cdiv(k, tk),)
    est = 2 * tk * per_col + m * n * 2 + n * 4
    cost = pl.CostEstimate(
        flops=4 * m * n * k, transcendentals=0,
        bytes_accessed=m * n * 2 + n * k * 4 + n * 4 + n * k * out_isz)
    return pl.pallas_call(
        _forward_kernel,
        out_shape=jax.ShapeDtypeStruct((n, k), out_dtype),
        grid=grid,
        in_specs=[pl.BlockSpec((m, n), lambda i: (0, 0)),          # resident
                  pl.BlockSpec((n, tk), lambda i: (0, i)),         # streamed
                  pl.BlockSpec((n, 1), lambda i: (0, 0))],         # resident
        out_specs=pl.BlockSpec((n, tk), lambda i: (0, i)),
        compiler_params=_compiler_params(est),
        cost_estimate=cost,
    )(w_bf, x, b)


@partial(jax.jit, static_argnames=("block_k", "out_dtype"))
def toy_model_forward_with_hidden(w, x, b, block_k=2048, out_dtype=jnp.bfloat16):
    """Fused path: returns (hidden, out) from a single pallas_call."""
    m, n = w.shape
    n2, k = x.shape
    assert n2 == n

    w_bf = w.astype(jnp.bfloat16)
    out_isz = jnp.dtype(out_dtype).itemsize
    per_col = n * 4 + m * 4 + n * out_isz
    tk = _pick_tk(k, block_k, per_col)
    grid = (pl.cdiv(k, tk),)
    est = 2 * tk * per_col + m * n * 2 + n * 4
    cost = pl.CostEstimate(
        flops=4 * m * n * k, transcendentals=0,
        bytes_accessed=m * n * 2 + n * k * 4 + n * 4 + m * k * 4
                       + n * k * out_isz)
    return pl.pallas_call(
        _fused_kernel,
        out_shape=(jax.ShapeDtypeStruct((m, k), jnp.float32),
                   jax.ShapeDtypeStruct((n, k), out_dtype)),
        grid=grid,
        in_specs=[pl.BlockSpec((m, n), lambda i: (0, 0)),
                  pl.BlockSpec((n, tk), lambda i: (0, i)),
                  pl.BlockSpec((n, 1), lambda i: (0, 0))],
        out_specs=[pl.BlockSpec((m, tk), lambda i: (0, i)),
                   pl.BlockSpec((n, tk), lambda i: (0, i))],
        compiler_params=_compiler_params(est),
        cost_estimate=cost,
    )(w_bf, x, b)


def init_params(key, n, m):
    # nn.init.xavier_uniform_ on w of shape (m, n): fan_in = n, fan_out = m
    bound = jnp.sqrt(6.0 / (n + m))
    w = jax.random.uniform(key, (m, n), jnp.float32, minval=-bound, maxval=bound)
    b = jnp.zeros((n, 1), jnp.float32)
    return w, b


if __name__ == "__main__":
    # Small TPU-friendly shapes consistent with the module's forward:
    # n (feature dim) = 256, m (bottleneck) = 8, batch k = 512 columns.
    n, m, k = 256, 8, 512
    key = jax.random.PRNGKey(0)
    kw, kx = jax.random.split(key)

    w, b = init_params(kw, n, m)
    x = jax.random.normal(kx, (n, k), jnp.float32)

    out = toy_model_forward(w, x, b)                                 # relu(w.T(w x)+b)
    hidden = toy_model_forward(w, x, b, return_hidden_state=True)    # w x
    h_fused, out_fused = toy_model_forward_with_hidden(w, x, b)      # both, one call
    jax.block_until_ready((out, hidden, h_fused, out_fused))

    assert out.shape == (n, k) and out.dtype == jnp.bfloat16
    assert hidden.shape == (m, k) and hidden.dtype == jnp.float32
    assert h_fused.shape == (m, k) and out_fused.shape == (n, k)

    # Check against a plain-JAX reference using the same bf16-operand /
    # f32-accumulate mixed precision the kernels use.
    w_bf = w.astype(jnp.bfloat16)
    x_bf = x.astype(jnp.bfloat16)
    ref_h = jnp.dot(w_bf, x_bf, preferred_element_type=jnp.float32)
    ref_out = jnp.maximum(
        lax.dot_general(w_bf, ref_h.astype(jnp.bfloat16),
                        dimension_numbers=(((0,), (0,)), ((), ())),
                        preferred_element_type=jnp.float32) + b, 0.0)
    assert jnp.allclose(hidden, ref_h, atol=1e-3, rtol=1e-3)
    assert jnp.allclose(h_fused, ref_h, atol=1e-3, rtol=1e-3)
    assert jnp.allclose(out.astype(jnp.float32), ref_out, atol=3e-2, rtol=3e-2)
    assert jnp.allclose(out_fused.astype(jnp.float32), ref_out, atol=3e-2, rtol=3e-2)

    # Loose check against the pure-f32 PyTorch-equivalent math (bf16 operands
    # and the bf16 output store introduce small rounding differences).
    f32_h = w @ x
    f32_out = jnp.maximum(w.T @ f32_h + b, 0.0)
    assert jnp.allclose(hidden, f32_h, atol=5e-2, rtol=5e-2)
    assert jnp.allclose(out.astype(jnp.float32), f32_out, atol=1e-1, rtol=1e-1)

    print("KERNEL_OK")
</pallas_src>

<mosaic_0001>
module attributes {stable_mosaic.version = 11 : i64} {
  func.func @_forward_kernel(%arg0: i32, %arg1: memref<8x256xbf16, #tpu.memory_space<vmem>>, %arg2: memref<256x256xf32, #tpu.memory_space<vmem>>, %arg3: memref<256x1xf32, #tpu.memory_space<vmem>>, %arg4: memref<256x256xbf16, #tpu.memory_space<vmem>>) attributes {dimension_semantics = [#tpu.dimension_semantics<parallel>], iteration_bounds = array<i64: 2>, scalar_prefetch = 0 : i64, scratch_operands = 0 : i64, tpu.core_type = #tpu.core_type<tc>, window_params = [{pipeline_mode = #tpu.pipeline_mode<synchronous>, transform_indices = @transform_0, window_bounds = array<i64: 8, 256>}, {transform_indices = @transform_1, window_bounds = array<i64: 256, 256>}, {pipeline_mode = #tpu.pipeline_mode<synchronous>, transform_indices = @transform_2, window_bounds = array<i64: 256, 1>}, {transform_indices = @transform_3, window_bounds = array<i64: 256, 256>}]} {
    %c0 = arith.constant 0 : index
    %c0_0 = arith.constant 0 : index
    %0 = vector.load %arg1[%c0, %c0_0] : memref<8x256xbf16, #tpu.memory_space<vmem>>, vector<8x256xbf16>
    %c0_1 = arith.constant 0 : index
    %c0_2 = arith.constant 0 : index
    %1 = vector.load %arg2[%c0_1, %c0_2] : memref<256x256xf32, #tpu.memory_space<vmem>>, vector<256x256xf32>
    %2 = arith.truncf %1 : vector<256x256xf32> to vector<256x256xbf16>
    %cst = arith.constant dense<0.000000e+00> : vector<8x256xf32>
    %3 = tpu.matmul %0, %2, %cst {dimension_numbers = #tpu.dot_dimension_numbers<[1], [0], [0], [1], [0, 0, 1, 1], [], []>} : vector<8x256xbf16>, vector<256x256xbf16>, vector<8x256xf32> -> vector<8x256xf32>
    %4 = arith.truncf %3 : vector<8x256xf32> to vector<8x256xbf16>
    %cst_3 = arith.constant dense<0.000000e+00> : vector<256x256xf32>
    %5 = tpu.matmul %0, %4, %cst_3 {dimension_numbers = #tpu.dot_dimension_numbers<[0], [0], [1], [1], [0, 1, 1, 1], [], []>} : vector<8x256xbf16>, vector<8x256xbf16>, vector<256x256xf32> -> vector<256x256xf32>
    %c0_4 = arith.constant 0 : index
    %c0_5 = arith.constant 0 : index
    %6 = vector.load %arg3[%c0_4, %c0_5] : memref<256x1xf32, #tpu.memory_space<vmem>>, vector<256x1xf32>
    %7 = vector.broadcast %6 : vector<256x1xf32> to vector<256x256xf32>
    %8 = arith.addf %5, %7 : vector<256x256xf32>
    %cst_6 = arith.constant 0.000000e+00 : f32
    %9 = vector.broadcast %cst_6 : f32 to vector<256x256xf32>
    %10 = arith.maximumf %8, %9 : vector<256x256xf32>
    %11 = arith.truncf %10 : vector<256x256xf32> to vector<256x256xbf16>
    %c0_7 = arith.constant 0 : index
    %c0_8 = arith.constant 0 : index
    %12 = vector.load %arg4[%c0_7, %c0_8] : memref<256x256xbf16, #tpu.memory_space<vmem>>, vector<256x256xbf16>
    tpu.vector_store %arg4[%c0_7, %c0_8], %11 {strides = array<i32>} : memref<256x256xbf16, #tpu.memory_space<vmem>>, vector<256x256xbf16>,
    return
  }
  func.func @transform_0(%arg0: i32) -> (i32, i32) {
    %c0_i32 = arith.constant 0 : i32
    %c0_i32_0 = arith.constant 0 : i32
    %c0_i32_1 = arith.constant 0 : i32
    return %c0_i32, %c0_i32_0 : i32, i32
  }
  func.func @transform_1(%arg0: i32) -> (i32, i32) {
    %c0_i32 = arith.constant 0 : i32
    %c0_i32_0 = arith.constant 0 : i32
    return %c0_i32, %arg0 : i32, i32
  }
  func.func @transform_2(%arg0: i32) -> (i32, i32) {
    %c0_i32 = arith.constant 0 : i32
    %c0_i32_0 = arith.constant 0 : i32
    %c0_i32_1 = arith.constant 0 : i32
    return %c0_i32, %c0_i32_0 : i32, i32
  }
  func.func @transform_3(%arg0: i32) -> (i32, i32) {
    %c0_i32 = arith.constant 0 : i32
    %c0_i32_0 = arith.constant 0 : i32
    return %c0_i32, %arg0 : i32, i32
  }
}

</mosaic_0001>

<bundles_post_ra>
// kernel: toy_model_forward.1
= control target key start
LH: loop header
LB: loop body
LE: loop exit
PB: predicated region body
PF: predicated region fallthrough
CT: control target
= control target key end

     0   :  { %8 = vsyncpa [#allocation3], 0  ;;  %s1899_s0 = inlined_call_operand.vmem [shape: bf16[8,256], index: 0, kind: input, shape index: {}]   ;;  %s1900_s1 = inlined_call_operand.hbm [shape: f32[256,512], index: 1, kind: input, shape index: {}]   ;;  %s1901_s2 = inlined_call_operand.vmem [shape: f32[256,1], index: 2, kind: input, shape index: {}]   ;;  %s1902_s3 = inlined_call_operand.hbm [shape: bf16[256,512], index: 3, kind: output, shape index: {}]  }
   0x1   :  { %10 = vsyncpa [#allocation3 + $0x1], 0 }
   0x2   :  { %11 = vsyncpa [#allocation4], 0 }
   0x3   :  { %13 = vsyncpa [#allocation4 + $0x1], 0  ;;  %s1472_s12 = smov 0   ;;  %s1474_s13 = smov 0  }
   0x4   :  { %s1476_s14 = smov 0   ;;  %s1478_s15 = smov 0  }
   0x5 LB: > { %s1493_s16 = sadd.s32 4294967295, %s1441_s15   ;;  %s1187_s17 = sadd.s32 4294967294, %s1441_s15   ;;  %s1441_s15 = sphi %s1478_s15, %s1916_s15   ;;  %s1437_s14 = sphi %s1476_s14, %s1915_s14   ;;  %s1433_s13 = sphi %s1474_s13, %s1914_s13   ;;  %s1429_s12 = sphi %s1472_s12, %s1913_s12  }
   0x6   : > { %s1497_s18 = sadd.s32 1, %s1441_s15   ;;  %s47_s19 = sadd.s32 1, %s1437_s14 }
   0x7   : > { %s44_s20 = ssub.s32 %s1441_s15, %s1497_s18  ;;  %p54_p0 = scmp.ne.s32.totalorder %s1437_s14, %s1433_s13 }
   0x8   : > { %p45_p1 = scmp.eq.s32.totalorder %s44_s20, 0  ;;  %p55_p2 = scmp.eq.s32.totalorder %s1441_s15, 0 }
   0x9   : > { %p60_p3 = scmp.ne.s32.totalorder %s1433_s13, %s1429_s12  ;;  %p61_p4 = scmp.eq.s32.totalorder %s1493_s16, 0 }
   0xa   : > { %s1509_s21 = scalar_select %p45_p1, %s1437_s14, %s47_s19  }
   0xb   : > { %p1511_p5 = por %p55_p2, %p54_p0  ;;  %p1515_p6 = por %p61_p4, %p60_p3 }
   0xc   : > { %p105_p7 = scmp.eq.s32.totalorder %s1493_s16, 1  ;;  %p111_p8 = scmp.eq.s32.totalorder %s1187_s17, 1 }
   0xd   : > { %p1300_p10 = scmp.lt.s32.totalorder %s1441_s15, 2  ;;  %s137_s26 = sand.u32 1, %s1437_s14  }
   0xe   : > { %p1522_p11 = por %p105_p7, %p54_p0  ;;  %p1526_p12 = por %p111_p8, %p60_p3 }
   0xf   : > { %s1252_s27 = sshll.u32 %s1441_s15, 8  ;;  %s1190_s28 = sshll.u32 %s137_s26, 9 }
  0x10   : > { %s1906_s24 = scalar_select %p1522_p11, 1, 0 }
  0x11   : > { %s1907_s25 = scalar_select %p1526_p12, 1, 0 }
  0x12   : > { %s1535_s4 = scalar_lea.hbm %s1900_s1, %s1252_s27  ;;  %s141_s5 = scalar_lea.vmem [#allocation2], %s1190_s28 }
  0x13   : > { %s148_s6 = sshll.u32 %s141_s5, 4  ;;  %p1539_p13 = pnand %p1300_p10, %p1511_p5  ;;  %s1543_s6 = int_to_ptr.vmem [resolvable:$true] %s148_s6 }
  0x14   : > { %s1546_s8 = scalar_lea.sflag [#allocation3], %s137_s26  ;;  %s1345_s9 = scalar_lea.hbm %s1535_s4, 8192 }
  0x15   : > { %p1346_p1 = scmp.ne.s32.totalorder %s1535_s4, %s1345_s9  ;;  %p1347_p2 = pneg %p1539_p13 }
  0x16   : > { %s1350_s17 = scalar_lea.hbm %s1900_s1, 16384  ;;  %p1351_p5 = scmp.lt.u32.totalorder %s1535_s4, %s1900_s1 }
  0x17   : > { %p1348_p3 = pnand %p1347_p2, %p1346_p1  ;;  %p1352_p7 = scmp.lt.u32.totalorder %s1350_s17, %s1345_s9 }
  0x18   : > { %p1354_p10 = scmp.lt.u32.totalorder %s1345_s9, %s1535_s4 }
  0x19   : > { %p1349_p4 = pneg %p1348_p3  ;;  %p1353_p8 = por %p1352_p7, %p1351_p5 }
  0x1b   : > { %p1355_p9 = por %p1354_p10, %p1353_p8 }
  0x1d   : > { %p1356_p0 = pnand %p1355_p9, %p1349_p4 }
  0x1f   : > { %1359 = shalt.err (!%p1356_p0)
}
  0x20   : > { %s1360_s22 = scalar_lea.vmem %s1543_s6, 8192  ;;  %s1443_s26 = smov [#allocation2]  }
  0x21   : > { %p1361_p1 = scmp.ne.s32.totalorder %s1543_s6, %s1360_s22  ;;  %s1365_s27 = sshll.u32 %s1443_s26, 4  ;;  %s1366_s27 = int_to_ptr.vmem [resolvable:$false] %s1365_s27 }
  0x22   : > { %s1367_s28 = scalar_lea.vmem %s1366_s27, 16384  ;;  %p1368_p11 = scmp.lt.s32.totalorder %s1543_s6, %s1366_s27 }
  0x23   : > { %p1363_p3 = pnand %p1361_p1, %p1347_p2  ;;  %p1369_p5 = scmp.lt.s32.totalorder %s1367_s28, %s1360_s22 }
  0x25   : > { %p1364_p12 = pneg %p1363_p3  ;;  %p1370_p7 = por %p1369_p5, %p1368_p11 }
  0x27   : > { %p1371_p8 = pnand %p1370_p7, %p1364_p12 }
  0x29   : > { %1374 = shalt.err (!%p1371_p8)
}
  0x2a   : > { %s1444_s29 = smov 512   ;;  %s1445_s30 = smov 256  }
  0x2b   : > { %s1446_s5 = smov 16   ;;  %p156_p9 = scmp.lt.s32.totalorder %s1441_s15, 3 }
  0x2c   : > { %1295 = dma.hbm_to_vmem [thread:$0]  (!%p1539_p13), %s1535_s4, 8192, %s1543_s6, %s1546_s8, %s1444_s29, %s1445_s30, %s1446_s5  }
  0x2d   : > { %p1909_p0 = scmp.ge.s32.totalorder %s1441_s15, 1 }
  0x2f   : > { %p157_p2 = pnand %p1909_p0, %p156_p9 }
  0x30   : > { %s1578_s9 = sand.u32 (!%p157_p2), 1, %s1433_s13  }
  0x31   : > { %160 = sbr.rel (%p157_p2) target bundleno = 676 (0x2a4), region = 32  ;;  %s1194_s10 = sshll.u32 (!%p157_p2), %s1578_s9, 9 }
  0x32   : > { %s163_s11 = scalar_lea.sflag (!%p157_p2), [#allocation3], %s1578_s9  ;;  %s1582_s17 = scalar_lea.vmem (!%p157_p2), [#allocation2], %s1194_s10 }
  0x38   : > { %1420 = dma.done.wait (%p1515_p6), %s163_s11, 8192  }
  0x39   : > { %1422 = vsyncadd (%p1515_p6), %s163_s11, 4294959104  ;;  %v194_v0 = vld [vmem:[%s1582_s17 + $0x8] sm:$0xff]  ;;  %v196_v1 = vld [vmem:[%s1582_s17 + $0x18] sm:$0xff]  ;;  %vm612_vm0 = vcmask 1043456   ;;  %vm563_vm1 = vcmask 64512   ;;  %s1195_s11 = sshll.u32 %s1578_s9, 8 }
  0x3a   : > { %v193_v2 = vld [vmem:[%s1582_s17] sm:$0xff]  ;;  %v258_v3 = vpack.c.bf16 %v196_v1, %v194_v0  ;;  %v195_v4 = vld [vmem:[%s1582_s17 + $0x10] sm:$0xff]  ;;  %v198_v5 = vld [vmem:[%s1582_s17 + $0x28] sm:$0xff]  ;;  %s1285_s23 = sshll.u32 %s1493_s16, 7  ;;  %s1101_s16 = scalar_lea.sflag [#allocation4], %s1578_s9 }
  0x3b   : > { %v200_v6 = vld [vmem:[%s1582_s17 + $0x38] sm:$0xff]  ;;  %v257_v7 = vpack.c.bf16 %v195_v4, %v193_v2  ;;  %v197_v9 = vld [vmem:[%s1582_s17 + $0x20] sm:$0xff]  ;;  %v199_v10 = vld [vmem:[%s1582_s17 + $0x30] sm:$0xff]  ;;  %s1851_s8 = scalar_lea.hbm %s1902_s3, %s1285_s23  ;;  %p1910_p11 = scmp.ne.s32.totalorder %s1906_s24, 0 }
  0x3c   : > { %v260_v8 = vpack.c.bf16 %v200_v6, %v198_v5  ;;  %v202_v11 = vld [vmem:[%s1582_s17 + $0x48] sm:$0xff]  ;;  %296 = vmatprep.subr.bf16.mxu0 %v258_v3  ;;  %v204_v12 = vld [vmem:[%s1582_s17 + $0x58] sm:$0xff]  ;;  %v259_v13 = vpack.c.bf16 %v199_v10, %v197_v9  ;;  %v201_v15 = vld [vmem:[%s1582_s17 + $0x40] sm:$0xff]  ;;  %s1448_s20 = smov [#allocation5]  }
  0x3d   : > { %297 = vmatpush1.bf16.msra.mxu0 %v257_v7  ;;  %v262_v14 = vpack.c.bf16 %v204_v12, %v202_v11  ;;  %v203_v16 = vld [vmem:[%s1582_s17 + $0x50] sm:$0xff]  ;;  %v206_v17 = vld [vmem:[%s1582_s17 + $0x68] sm:$0xff]  ;;  %v208_v18 = vld [vmem:[%s1582_s17 + $0x78] sm:$0xff]  ;;  %s1379_s22 = sshll.u32 %s1448_s20, 4  ;;  %s1380_s22 = int_to_ptr.vmem [resolvable:$false] %s1379_s22 }
  0x3e   : > { %298 = vmatprep.subr.bf16.mxu0 %v260_v8  ;;  %v261_v19 = vpack.c.bf16 %v203_v16, %v201_v15  ;;  %v264_v20 = vpack.c.bf16 %v208_v18, %v206_v17  ;;  %v205_v21 = vld [vmem:[%s1582_s17 + $0x60] sm:$0xff]  ;;  %v207_v22 = vld [vmem:[%s1582_s17 + $0x70] sm:$0xff]  ;;  %v210_v23 = vld [vmem:[%s1582_s17 + $0x88] sm:$0xff]  ;;  %s1381_s26 = scalar_lea.vmem %s1380_s22, 8192 }
  0x3f   : > { %v212_v24 = vld [vmem:[%s1582_s17 + $0x98] sm:$0xff]  ;;  %v263_v25 = vpack.c.bf16 %v207_v22, %v205_v21  ;;  %v209_v27 = vld [vmem:[%s1582_s17 + $0x80] sm:$0xff]  ;;  %v211_v28 = vld [vmem:[%s1582_s17 + $0x90] sm:$0xff] }
  0x40   : > { %v266_v26 = vpack.c.bf16 %v212_v24, %v210_v23  ;;  %v214_v29 = vld [vmem:[%s1582_s17 + $0xa8] sm:$0xff]  ;;  %v216_v30 = vld [vmem:[%s1582_s17 + $0xb8] sm:$0xff]  ;;  %v265_v31 = vpack.c.bf16 %v211_v28, %v209_v27  ;;  %v213_v33 = vld [vmem:[%s1582_s17 + $0xa0] sm:$0xff] }
  0x41   : > { %299 = vmatpush1.bf16.msra.mxu0 %v259_v13  ;;  %v268_v32 = vpack.c.bf16 %v216_v30, %v214_v29  ;;  %v215_v34 = vld [vmem:[%s1582_s17 + $0xb0] sm:$0xff]  ;;  %v218_v35 = vld [vmem:[%s1582_s17 + $0xc8] sm:$0xff]  ;;  %v220_v36 = vld [vmem:[%s1582_s17 + $0xd8] sm:$0xff] }
  0x42   : > { %300 = vmatprep.subr.bf16.mxu0 %v262_v14  ;;  %v267_v37 = vpack.c.bf16 %v215_v34, %v213_v33  ;;  %v270_v38 = vpack.c.bf16 %v220_v36, %v218_v35  ;;  %v217_v39 = vld [vmem:[%s1582_s17 + $0xc0] sm:$0xff]  ;;  %v219_v40 = vld [vmem:[%s1582_s17 + $0xd0] sm:$0xff]  ;;  %v222_v42 = vld [vmem:[%s1582_s17 + $0xe8] sm:$0xff]  ;;  %v1447_v36 = vmov 0  }
  0x43   : > { %v192_v41 = vld [vmem:[%s1899_s0] sm:$0xff]  ;;  %v224_v43 = vld [vmem:[%s1582_s17 + $0xf8] sm:$0xff]  ;;  %v269_v46 = vpack.c.bf16 %v219_v40, %v217_v39  ;;  %v223_v49 = vld [vmem:[%s1582_s17 + $0xf0] sm:$0xff]  ;;  %1341 = vset.pattern.permute.xlu1 %v1447_v36  ;;  %681 = vmatprep.mubr.bf16.mxu1 %v1447_v36 }
  0x44   : > { %v1621_v44 = vcombine.high %v192_v41, %v192_v41  ;;  %v1623_v45 = vcombine.low %v192_v41, %v192_v41  ;;  %v272_v47 = vpack.c.bf16 %v224_v43, %v222_v42  ;;  %v221_v48 = vld [vmem:[%s1582_s17 + $0xe0] sm:$0xff]  ;;  %v226_v50 = vld [vmem:[%s1582_s17 + $0x108] sm:$0xff]  ;;  %v228_v51 = vld [vmem:[%s1582_s17 + $0x118] sm:$0xff] }
  0x45   : > { %301 = vmatpush1.bf16.msra.mxu0 %v261_v19  ;;  %v271_v52 = vpack.c.bf16 %v223_v49, %v221_v48  ;;  %v274_v53 = vpack.c.bf16 %v228_v51, %v226_v50  ;;  %v225_v54 = vld [vmem:[%s1582_s17 + $0x100] sm:$0xff]  ;;  %v227_v55 = vld [vmem:[%s1582_s17 + $0x110] sm:$0xff]  ;;  %v230_v56 = vld [vmem:[%s1582_s17 + $0x128] sm:$0xff] }
  0x46   : > { %302 = vmatprep.subr.bf16.mxu0 %v264_v20  ;;  %328 = vmatprep.mubr.bf16.mxu0 %v1621_v44  ;;  %v232_v57 = vld [vmem:[%s1582_s17 + $0x138] sm:$0xff]  ;;  %v273_v58 = vpack.c.bf16 %v227_v55, %v225_v54  ;;  %v229_v60 = vld [vmem:[%s1582_s17 + $0x120] sm:$0xff]  ;;  %v231_v61 = vld [vmem:[%s1582_s17 + $0x130] sm:$0xff] }
  0x47   : > { %531 = vxpose.xlu0.c.b16.start.end [1/1] (short) %v1623_v45, 128  ;;  %v276_v59 = vpack.c.bf16 %v232_v57, %v230_v56  ;;  %v234_v62 = vld [vmem:[%s1582_s17 + $0x148] sm:$0xff]  ;;  %v236_v63 = vld [vmem:[%s1582_s17 + $0x158] sm:$0xff]  ;;  %v275_v0 = vpack.c.bf16 %v231_v61, %v229_v60  ;;  %v233_v2 = vld [vmem:[%s1582_s17 + $0x140] sm:$0xff] }
  0x48   : > { %v278_v1 = vpack.c.bf16 %v236_v63, %v234_v62  ;;  %v235_v3 = vld [vmem:[%s1582_s17 + $0x150] sm:$0xff]  ;;  %v238_v4 = vld [vmem:[%s1582_s17 + $0x168] sm:$0xff]  ;;  %v240_v5 = vld [vmem:[%s1582_s17 + $0x178] sm:$0xff] }
  0x49   : > { %303 = vmatpush1.bf16.msra.mxu0 %v263_v25  ;;  %v277_v6 = vpack.c.bf16 %v235_v3, %v233_v2  ;;  %v280_v7 = vpack.c.bf16 %v240_v5, %v238_v4  ;;  %v237_v8 = vld [vmem:[%s1582_s17 + $0x160] sm:$0xff]  ;;  %v239_v9 = vld [vmem:[%s1582_s17 + $0x170] sm:$0xff]  ;;  %v242_v10 = vld [vmem:[%s1582_s17 + $0x188] sm:$0xff] }
  0x4a   : > { %304 = vmatprep.subr.bf16.mxu0 %v266_v26  ;;  %v244_v11 = vld [vmem:[%s1582_s17 + $0x198] sm:$0xff]  ;;  %v279_v12 = vpack.c.bf16 %v239_v9, %v237_v8  ;;  %v241_v14 = vld [vmem:[%s1582_s17 + $0x180] sm:$0xff]  ;;  %v243_v15 = vld [vmem:[%s1582_s17 + $0x190] sm:$0xff] }
  0x4b   : > { %v282_v13 = vpack.c.bf16 %v244_v11, %v242_v10  ;;  %v246_v16 = vld [vmem:[%s1582_s17 + $0x1a8] sm:$0xff]  ;;  %v248_v17 = vld [vmem:[%s1582_s17 + $0x1b8] sm:$0xff]  ;;  %v281_v18 = vpack.c.bf16 %v243_v15, %v241_v14  ;;  %v245_v20 = vld [vmem:[%s1582_s17 + $0x1a0] sm:$0xff] }
  0x4c   : > { %v284_v19 = vpack.c.bf16 %v248_v17, %v246_v16  ;;  %v247_v21 = vld [vmem:[%s1582_s17 + $0x1b0] sm:$0xff]  ;;  %v250_v22 = vld [vmem:[%s1582_s17 + $0x1c8] sm:$0xff]  ;;  %v252_v23 = vld [vmem:[%s1582_s17 + $0x1d8] sm:$0xff] }
  0x4d   : > { %305 = vmatpush1.bf16.msra.mxu0 %v265_v31  ;;  %v283_v24 = vpack.c.bf16 %v247_v21, %v245_v20  ;;  %v286_v25 = vpack.c.bf16 %v252_v23, %v250_v22  ;;  %v249_v26 = vld [vmem:[%s1582_s17 + $0x1c0] sm:$0xff]  ;;  %v251_v27 = vld [vmem:[%s1582_s17 + $0x1d0] sm:$0xff]  ;;  %v254_v28 = vld [vmem:[%s1582_s17 + $0x1e8] sm:$0xff] }
  0x4e   : > { %306 = vmatprep.subr.bf16.mxu0 %v268_v32  ;;  %v256_v29 = vld [vmem:[%s1582_s17 + $0x1f8] sm:$0xff]  ;;  %v285_v30 = vpack.c.bf16 %v251_v27, %v249_v26  ;;  %v253_v32 = vld [vmem:[%s1582_s17 + $0x1e0] sm:$0xff]  ;;  %v255_v33 = vld [vmem:[%s1582_s17 + $0x1f0] sm:$0xff]  ;;  %s1804_s17 = scalar_lea.vmem [#allocation5], %s1195_s11 }
  0x4f   : > { %v288_v31 = vpack.c.bf16 %v256_v29, %v254_v28  ;;  %v287_v34 = vpack.c.bf16 %v255_v33, %v253_v32  ;;  %v339_v35 = vld [vmem:[%s1901_s2] sm:$0xff]  ;;  %v342_v39 = vld [vmem:[%s1901_s2 + $0x18] sm:$0xff]  ;;  %v344_v41 = vld [vmem:[%s1901_s2 + $0x28] sm:$0xff]  ;;  %s1114_s4 = sshll.u32 %s1804_s17, 4  ;;  %s1853_s4 = int_to_ptr.vmem [resolvable:$true] %s1114_s4 }
  0x50   : > { %373 = vperm.xlu1 %1341, %v339_v35   ;;  %v343_v40 = vld [vmem:[%s1901_s2 + $0x20] sm:$0xff]  ;;  %v345_v42 = vld [vmem:[%s1901_s2 + $0x30] sm:$0xff]  ;;  %v346_v43 = vld [vmem:[%s1901_s2 + $0x38] sm:$0xff]  ;;  %s1375_s19 = scalar_lea.vmem %s1853_s4, 4096  ;;  %p1382_p4 = scmp.lt.s32.totalorder %s1853_s4, %s1380_s22 }
  0x51   : > { %307 = vmatpush1.bf16.msra.mxu0 %v267_v37  ;;  %v340_v37 = vld [vmem:[%s1901_s2 + $0x8] sm:$0xff]  ;;  %v353_v49 = vld [vmem:[%s1901_s2 + $0x70] sm:$0xff]  ;;  %v354_v50 = vld [vmem:[%s1901_s2 + $0x78] sm:$0xff]  ;;  %p1376_p6 = scmp.ne.s32.totalorder %s1853_s4, %s1375_s19  ;;  %p1383_p10 = scmp.lt.s32.totalorder %s1381_s26, %s1375_s19 }
  0x52   : > { %308 = vmatprep.subr.bf16.mxu0 %v270_v38  ;;  %v341_v38 = vld [vmem:[%s1901_s2 + $0x10] sm:$0xff]  ;;  %v352_v48 = vld [vmem:[%s1901_s2 + $0x68] sm:$0xff]  ;;  %v355_v51 = vld [vmem:[%s1901_s2 + $0x80] sm:$0xff] }
  0x53   : > { %v359_v54 = vld [vmem:[%s1901_s2 + $0xa0] sm:$0xff]  ;;  %v361_v55 = vld [vmem:[%s1901_s2 + $0xb0] sm:$0xff]  ;;  %v348_v60 = vld [vmem:[%s1901_s2 + $0x48] sm:$0xff]  ;;  %p1377_p12 = pnand %p1376_p6, %p1910_p11  ;;  %p1384_p1 = por %p1383_p10, %p1382_p4 }
  0x54   : > { %378 = vperm.xlu1 %1341, %v340_v37   ;;  %v363_v56 = vld [vmem:[%s1901_s2 + $0xc0] sm:$0xff]  ;;  %v365_v57 = vld [vmem:[%s1901_s2 + $0xd0] sm:$0xff]  ;;  %v358_v61 = vld [vmem:[%s1901_s2 + $0x98] sm:$0xff] }
  0x55   : > { %309 = vmatpush1.bf16.msra.mxu0 %v269_v46  ;;  %v350_v46 = vld [vmem:[%s1901_s2 + $0x58] sm:$0xff]  ;;  %v360_v62 = vld [vmem:[%s1901_s2 + $0xa8] sm:$0xff]  ;;  %p1378_p13 = pneg %p1377_p12 }
  0x56   : > { %310 = vmatprep.subr.bf16.mxu0 %v272_v47  ;;  %v351_v47 = vld [vmem:[%s1901_s2 + $0x60] sm:$0xff]  ;;  %v362_v63 = vld [vmem:[%s1901_s2 + $0xb8] sm:$0xff]  ;;  %v368_v4 = vld [vmem:[%s1901_s2 + $0xe8] sm:$0xff] }
  0x57   : > { %v366_v2 = vld [vmem:[%s1901_s2 + $0xd8] sm:$0xff]  ;;  %p1385_p3 = pnand %p1384_p1, %p1378_p13 }
  0x58   : > { %383 = vperm.xlu1 %1341, %v341_v38   ;;  %v370_v5 = vld [vmem:[%s1901_s2 + $0xf8] sm:$0xff] }
  0x59   : > { %311 = vmatpush1.bf16.msra.mxu0 %v271_v52  ;;  %v356_v52 = vld [vmem:[%s1901_s2 + $0x88] sm:$0xff] }
  0x5a   : > { %312 = vmatprep.subr.bf16.mxu0 %v274_v53  ;;  %v357_v53 = vld [vmem:[%s1901_s2 + $0x90] sm:$0xff] }
  0x5c   : > { %388 = vperm.xlu1 %1341, %v342_v39  }
  0x5d   : > { %313 = vmatpush1.bf16.msra.mxu0 %v273_v58  ;;  %v367_v58 = vld [vmem:[%s1901_s2 + $0xe0] sm:$0xff] }
  0x5e   : > { %314 = vmatprep.subr.bf16.mxu0 %v276_v59  ;;  %v369_v59 = vld [vmem:[%s1901_s2 + $0xf0] sm:$0xff] }
  0x60   : > { %393 = vperm.xlu1 %1341, %v343_v40  }
  0x61   : > { %315 = vmatpush1.bf16.msra.mxu0 %v275_v0  ;;  %v364_v0 = vld [vmem:[%s1901_s2 + $0xc8] sm:$0xff] }
  0x62   : > { %316 = vmatprep.subr.bf16.mxu0 %v278_v1 }
  0x64   : > { %547 = vxpose.xlu0.c.b16.start.end [1/1] (short) %v1621_v44, 128  ;;  %398 = vperm.xlu1 %1341, %v344_v41   ;;  %v347_v44 = vld [vmem:[%s1901_s2 + $0x40] sm:$0xff] }
  0x65   : > { %317 = vmatpush1.bf16.msra.mxu0 %v277_v6 }
  0x66   : > { %318 = vmatprep.subr.bf16.mxu0 %v280_v7 }
  0x68   : > { %403 = vperm.xlu1 %1341, %v345_v42  }
  0x69   : > { %319 = vmatpush1.bf16.msra.mxu0 %v279_v12 }
  0x6a   : > { %320 = vmatprep.subr.bf16.mxu0 %v282_v13 }
  0x6c   : > { %408 = vperm.xlu1 %1341, %v346_v43  }
  0x6d   : > { %321 = vmatpush1.bf16.msra.mxu0 %v281_v18  ;;  %1342 = vset.pattern.permute.xlu0 %v1447_v36 }
  0x6e   : > { %322 = vmatprep.subr.bf16.mxu0 %v284_v19 }
  0x70   : > { %413 = vperm.xlu1 %1341, %v347_v44  }
  0x71   : > { %323 = vmatpush1.bf16.msra.mxu0 %v283_v24 }
  0x72   : > { %324 = vmatprep.subr.bf16.mxu0 %v286_v25 }
  0x75   : > { %325 = vmatpush1.bf16.msra.mxu0 %v285_v30 }
  0x76   : > { %326 = vmatprep.subr.bf16.mxu0 %v288_v31 }
  0x79   : > { %327 = vmatpush1.bf16.msra.mxu0 %v287_v34 }
  0x7c   : > { %329 = vmatmul.mubr.bf16.vlgmr.msra.gmra.mrb[0].mxu0 %v1623_v45  ;;  %v349_v45 = vld [vmem:[%s1901_s2 + $0x50] sm:$0xff] }
  0x7d   : > { %651 = vmatprep.mubr.bf16.mxu0 %v1447_v36  ;;  %423 = vperm.xlu1 %1341, %v349_v45  }
  0x81   : > { %428 = vperm.xlu1 %1341, %v350_v46  }
  0x85   : > { %433 = vperm.xlu1 %1341, %v351_v47  }
  0x89   : > { %438 = vperm.xlu1 %1341, %v352_v48   ;;  %418 = vperm.xlu0 %1342, %v348_v60  }
  0x8d   : > { %443 = vperm.xlu1 %1341, %v353_v49   ;;  %468 = vperm.xlu0 %1342, %v358_v61  }
  0x91   : > { %448 = vperm.xlu1 %1341, %v354_v50   ;;  %478 = vperm.xlu0 %1342, %v360_v62  }
  0x95   : > { %453 = vperm.xlu1 %1341, %v355_v51   ;;  %488 = vperm.xlu0 %1342, %v362_v63  }
  0x99   : > { %458 = vperm.xlu1 %1341, %v356_v52   ;;  %498 = vperm.xlu0 %1342, %v364_v0  }
  0x9d   : > { %463 = vperm.xlu1 %1341, %v357_v53   ;;  %508 = vperm.xlu0 %1342, %v366_v2  }
  0xa1   : > { %473 = vperm.xlu1 %1341, %v359_v54   ;;  %518 = vperm.xlu0 %1342, %v368_v4  }
  0xa5   : > { %483 = vperm.xlu1 %1341, %v361_v55   ;;  %528 = vperm.xlu0 %1342, %v370_v5  }
  0xa9   : > { %493 = vperm.xlu1 %1341, %v363_v56  }
  0xad   : > { %503 = vperm.xlu1 %1341, %v365_v57   ;;  %v539_v1 = vpop.trf.xlu0 }
  0xb1   : > { %513 = vperm.xlu1 %1341, %v367_v58   ;;  %v540_v3 = vpop.trf.xlu0 }
  0xb5   : > { %523 = vperm.xlu1 %1341, %v369_v59   ;;  %v541_v6 = vpop.trf.xlu0 }
  0xb9   : > { %v542_v14 = vpop.trf.xlu0 }
  0xbd   : > { %v543_v15 = vpop.trf.xlu0 }
  0xc1   : > { %v544_v16 = vpop.trf.xlu0 }
  0xc5   : > { %v545_v17 = vpop.trf.xlu0 }
  0xc9   : > { %v546_v18 = vpop.trf.xlu0 }
  0xcd   : > { %v555_v19 = vpop.trf.xlu0 }
  0xcf   : > { %v374_v27 = vpop.permute.xlu1 %373 }
  0xd1   : > { %v556_v20 = vpop.trf.xlu0 }
  0xd3   : > { %v379_v28 = vpop.permute.xlu1 %378 }
  0xd5   : > { %v557_v21 = vpop.trf.xlu0 }
  0xd7   : > { %v384_v29 = vpop.permute.xlu1 %383 }
  0xd9   : > { %v558_v22 = vpop.trf.xlu0 }
  0xdb   : > { %v389_v30 = vpop.permute.xlu1 %388 }
  0xdd   : > { %v559_v23 = vpop.trf.xlu0 }
  0xdf   : > { %v1793_v31 = vpop.permute.xlu1 %393 }
  0xe1   : > { %v560_v24 = vpop.trf.xlu0 }
  0xe3   : > { %v1795_v32 = vpop.permute.xlu1 %398 }
  0xe5   : > { %v561_v25 = vpop.trf.xlu0 }
  0xe7   : > { %v404_v33 = vpop.permute.xlu1 %403 }
  0xe9   : > { %v562_v26 = vpop.trf.xlu0 }
  0xeb   : > { %v409_v34 = vpop.permute.xlu1 %408 }
  0xef   : > { %v414_v35 = vpop.permute.xlu1 %413 }
  0xfc   : > { %v1797_v37 = vpop.permute.xlu1 %423 }
 0x100   : > { %v1799_v38 = vpop.permute.xlu1 %428 }
 0x104   : > { %v1802_v0 = vpop.permute.xlu1 %433 }
 0x14f   : > { %v330_v7 = vpop.f32.mrb[0].mxu0 }
 0x150   : > { %v337_v8 = vpack.c.bf16 %v330_v7, %v330_v7  ;;  %v332_v9 = vpop.f32.mrb[1].mxu0 }
 0x151   : > { %v338_v10 = vpack.c.bf16 %v332_v9, %v332_v9  ;;  %v334_v11 = vpop.f32.mrb[2].mxu0 }
 0x152   : > { %v614_v12 = vsel %vm612_vm0, %v337_v8, 0  ;;  %v335_v13 = vpop.f32.mrb[3].mxu0 }
 0x153   : > { %1198 = vmatprep.subr.msk.bf16.mxu0 %vm612_vm0, %v338_v10  ;;  %1286 = vmatprep.subr.msk.bf16.mxu1 %vm612_vm0, %v338_v10 }
 0x154   : > { %620 = vmatpush1.bf16.msra.mxu0 %v614_v12  ;;  %1287 = vmatpush1.bf16.msra.mxu1 %v614_v12 }
 0x157   : > { %1199 = vmatmul.mubr.msk.bf16.vlgmr.msra.gmra.mrb[4].mxu0 %vm563_vm1, %v539_v1  ;;  %1202 = vmatmul.mubr.msk.bf16.vlgmr.msra.gmra.mrb[0].mxu1 %vm563_vm1, %v542_v14  ;;  %v419_v1 = vpop.permute.xlu0 %418 }
 0x158   : > { %661 = vmatprep.mubr.bf16.mxu0 %v1447_v36  ;;  %691 = vmatprep.mubr.bf16.mxu1 %v1447_v36 }
 0x15f   : > { %1200 = vmatmul.mubr.msk.bf16.gmra.mrb[8].mxu0 %vm563_vm1, %v540_v3  ;;  %1203 = vmatmul.mubr.msk.bf16.gmra.mrb[4].mxu1 %vm563_vm1, %v543_v15 }
 0x160   : > { %671 = vmatprep.mubr.bf16.mxu0 %v1447_v36  ;;  %701 = vmatprep.mubr.bf16.mxu1 %v1447_v36 }
 0x167   : > { %1201 = vmatmul.mubr.msk.bf16.gmra.mrb[12].mxu0 %vm563_vm1, %v541_v6  ;;  %1204 = vmatmul.mubr.msk.bf16.gmra.mrb[8].mxu1 %vm563_vm1, %v544_v16 }
 0x168   : > { %711 = vmatprep.mubr.bf16.mxu1 %v1447_v36 }
 0x16f   : > { %1205 = vmatmul.mubr.msk.bf16.gmra.mrb[12].mxu1 %vm563_vm1, %v545_v17 }
 0x170   : > { %721 = vmatprep.mubr.bf16.mxu1 %v1447_v36 }
 0x177   : > { %1206 = vmatmul.mubr.msk.bf16.gmra.mrb[16].mxu1 %vm563_vm1, %v546_v18 }
 0x178   : > { %731 = vmatprep.mubr.bf16.mxu1 %v1447_v36 }
 0x17f   : > { %1207 = vmatmul.mubr.msk.bf16.gmra.mrb[20].mxu1 %vm563_vm1, %v555_v19 }
 0x180   : > { %741 = vmatprep.mubr.bf16.mxu1 %v1447_v36 }
 0x187   : > { %1208 = vmatmul.mubr.msk.bf16.gmra.mrb[24].mxu1 %vm563_vm1, %v556_v20 }
 0x188   : > { %751 = vmatprep.mubr.bf16.mxu1 %v1447_v36 }
 0x18f   : > { %1209 = vmatmul.mubr.msk.bf16.gmra.mrb[28].mxu1 %vm563_vm1, %v557_v21 }
 0x190   : > { %761 = vmatprep.mubr.bf16.mxu1 %v1447_v36 }
 0x197   : > { %1210 = vmatmul.mubr.msk.bf16.gmra.mrb[32].mxu1 %vm563_vm1, %v558_v22 }
 0x198   : > { %771 = vmatprep.mubr.bf16.mxu1 %v1447_v36 }
 0x19f   : > { %1211 = vmatmul.mubr.msk.bf16.gmra.mrb[36].mxu1 %vm563_vm1, %v559_v23 }
 0x1a0   : > { %781 = vmatprep.mubr.bf16.mxu1 %v1447_v36 }
 0x1a7   : > { %1212 = vmatmul.mubr.msk.bf16.gmra.mrb[40].mxu1 %vm563_vm1, %v560_v24 }
 0x1a8   : > { %791 = vmatprep.mubr.bf16.mxu1 %v1447_v36 }
 0x1af   : > { %1213 = vmatmul.mubr.msk.bf16.gmra.mrb[44].mxu1 %vm563_vm1, %v561_v25 }
 0x1b0   : > { %801 = vmatprep.mubr.bf16.mxu1 %v1447_v36 }
 0x1b7   : > { %1214 = vmatmul.mubr.msk.bf16.gmra.mrb[48].mxu1 %vm563_vm1, %v562_v26 }
 0x22a   : > { %v653_v36 = vpop.f32.mrb[4].mxu0  ;;  %v683_v39 = vpop.f32.mrb[0].mxu1 }
 0x22b   : > { %v654_v40 = vadd.f32 %v653_v36, %v374_v27  ;;  %v684_v41 = vadd.f32 %v683_v39, %v404_v33  ;;  %v655_v42 = vpop.f32.mrb[5].mxu0  ;;  %v685_v43 = vpop.f32.mrb[1].mxu1 }
 0x22c   : > { %v656_v44 = vadd.f32 %v655_v42, %v374_v27  ;;  %v686_v45 = vadd.f32 %v685_v43, %v404_v33  ;;  %v657_v46 = vpop.f32.mrb[6].mxu0  ;;  %v687_v47 = vpop.f32.mrb[2].mxu1 }
 0x22d   : > { %v812_v48 = vmax.f32 %v654_v40, 0.0  ;;  %v824_v49 = vmax.f32 %v684_v41, 0.0  ;;  %v658_v50 = vadd.f32 %v657_v46, %v379_v28  ;;  %v688_v51 = vadd.f32 %v687_v47, %v409_v34  ;;  %v659_v52 = vpop.f32.mrb[7].mxu0  ;;  %v689_v53 = vpop.f32.mrb[3].mxu1 }
 0x22e   : > { %v813_v54 = vmax.f32 %v656_v44, 0.0  ;;  %v825_v55 = vmax.f32 %v686_v45, 0.0  ;;  %v660_v56 = vadd.f32 %v659_v52, %v379_v28  ;;  %v690_v57 = vadd.f32 %v689_v53, %v409_v34  ;;  %v439_v33 = vpop.permute.xlu1 %438 }
 0x22f   : > { %v814_v58 = vmax.f32 %v658_v50, 0.0  ;;  %v826_v59 = vmax.f32 %v688_v51, 0.0 }
 0x230   : > { %v1253_v60 = vpack.c.bf16 %v813_v54, %v812_v48  ;;  %v1259_v61 = vpack.c.bf16 %v825_v55, %v824_v49  ;;  %v815_v62 = vmax.f32 %v660_v56, 0.0  ;;  %v827_v63 = vmax.f32 %v690_v57, 0.0 }
 0x232   : > { %1068 = vst [vmem:[%s1804_s17] sm:$0xff] %v1253_v60  ;;  %1074 = vst [vmem:[%s1804_s17 + $0x30] sm:$0xff] %v1259_v61  ;;  %v1254_v2 = vpack.c.bf16 %v815_v62, %v814_v58  ;;  %v1260_v3 = vpack.c.bf16 %v827_v63, %v826_v59  ;;  %v663_v4 = vpop.f32.mrb[8].mxu0  ;;  %v693_v5 = vpop.f32.mrb[4].mxu1 }
 0x233   : > { %v664_v6 = vadd.f32 %v663_v4, %v384_v29  ;;  %v694_v7 = vadd.f32 %v693_v5, %v414_v35  ;;  %v665_v8 = vpop.f32.mrb[9].mxu0  ;;  %v695_v9 = vpop.f32.mrb[5].mxu1 }
 0x234   : > { %1069 = vst [vmem:[%s1804_s17 + $0x8] sm:$0xff] %v1254_v2  ;;  %1075 = vst [vmem:[%s1804_s17 + $0x38] sm:$0xff] %v1260_v3  ;;  %v666_v10 = vadd.f32 %v665_v8, %v384_v29  ;;  %v696_v11 = vadd.f32 %v695_v9, %v414_v35  ;;  %v667_v12 = vpop.f32.mrb[10].mxu0  ;;  %v697_v13 = vpop.f32.mrb[6].mxu1 }
 0x235   : > { %v816_v14 = vmax.f32 %v664_v6, 0.0  ;;  %v828_v15 = vmax.f32 %v694_v7, 0.0  ;;  %v668_v16 = vadd.f32 %v667_v12, %v389_v30  ;;  %v698_v17 = vadd.f32 %v697_v13, %v419_v1  ;;  %v669_v18 = vpop.f32.mrb[11].mxu0  ;;  %v699_v19 = vpop.f32.mrb[7].mxu1 }
 0x236   : > { %v817_v20 = vmax.f32 %v666_v10, 0.0  ;;  %v829_v21 = vmax.f32 %v696_v11, 0.0  ;;  %v670_v22 = vadd.f32 %v669_v18, %v389_v30  ;;  %v700_v23 = vadd.f32 %v699_v19, %v419_v1  ;;  %v444_v61 = vpop.permute.xlu1 %443 }
 0x237   : > { %v818_v24 = vmax.f32 %v668_v16, 0.0  ;;  %v830_v25 = vmax.f32 %v698_v17, 0.0 }
 0x238   : > { %v1255_v26 = vpack.c.bf16 %v817_v20, %v816_v14  ;;  %v1261_v27 = vpack.c.bf16 %v829_v21, %v828_v15  ;;  %v819_v28 = vmax.f32 %v670_v22, 0.0  ;;  %v831_v29 = vmax.f32 %v700_v23, 0.0 }
 0x23a   : > { %1070 = vst [vmem:[%s1804_s17 + $0x10] sm:$0xff] %v1255_v26  ;;  %1076 = vst [vmem:[%s1804_s17 + $0x40] sm:$0xff] %v1261_v27  ;;  %v1256_v34 = vpack.c.bf16 %v819_v28, %v818_v24  ;;  %v1262_v35 = vpack.c.bf16 %v831_v29, %v830_v25  ;;  %v673_v36 = vpop.f32.mrb[12].mxu0  ;;  %v703_v39 = vpop.f32.mrb[8].mxu1 }
 0x23b   : > { %v674_v40 = vadd.f32 %v673_v36, %v1793_v31  ;;  %v704_v30 = vadd.f32 %v703_v39, %v1797_v37  ;;  %v675_v41 = vpop.f32.mrb[13].mxu0  ;;  %v705_v42 = vpop.f32.mrb[9].mxu1 }
 0x23c   : > { %1071 = vst [vmem:[%s1804_s17 + $0x18] sm:$0xff] %v1256_v34  ;;  %1077 = vst [vmem:[%s1804_s17 + $0x48] sm:$0xff] %v1262_v35  ;;  %v676_v43 = vadd.f32 %v675_v41, %v1793_v31  ;;  %v706_v44 = vadd.f32 %v705_v42, %v1797_v37  ;;  %v677_v45 = vpop.f32.mrb[14].mxu0  ;;  %v707_v46 = vpop.f32.mrb[10].mxu1 }
 0x23d   : > { %v820_v47 = vmax.f32 %v674_v40, 0.0  ;;  %v832_v48 = vmax.f32 %v704_v30, 0.0  ;;  %v678_v49 = vadd.f32 %v677_v45, %v1795_v32  ;;  %v708_v50 = vadd.f32 %v707_v46, %v1799_v38  ;;  %v679_v51 = vpop.f32.mrb[15].mxu0  ;;  %v709_v52 = vpop.f32.mrb[11].mxu1 }
 0x23e   : > { %v821_v53 = vmax.f32 %v676_v43, 0.0  ;;  %v833_v54 = vmax.f32 %v706_v44, 0.0  ;;  %v680_v55 = vadd.f32 %v679_v51, %v1795_v32  ;;  %v710_v31 = vadd.f32 %v709_v52, %v1799_v38  ;;  %v449_v10 = vpop.permute.xlu1 %448  ;;  %v469_v51 = vpop.permute.xlu0 %468 }
 0x23f   : > { %v822_v37 = vmax.f32 %v678_v49, 0.0  ;;  %v834_v56 = vmax.f32 %v708_v50, 0.0 }
 0x240   : > { %v1257_v57 = vpack.c.bf16 %v821_v53, %v820_v47  ;;  %v1263_v58 = vpack.c.bf16 %v833_v54, %v832_v48  ;;  %v823_v59 = vmax.f32 %v680_v55, 0.0  ;;  %v835_v60 = vmax.f32 %v710_v31, 0.0 }
 0x242   : > { %1072 = vst [vmem:[%s1804_s17 + $0x20] sm:$0xff] %v1257_v57  ;;  %1078 = vst [vmem:[%s1804_s17 + $0x50] sm:$0xff] %v1263_v58  ;;  %v1258_v62 = vpack.c.bf16 %v823_v59, %v822_v37  ;;  %v1264_v63 = vpack.c.bf16 %v835_v60, %v834_v56  ;;  %v713_v1 = vpop.f32.mrb[12].mxu1  ;;  %v454_v21 = vpop.permute.xlu1 %453 }
 0x243   : > { %v714_v2 = vadd.f32 %v713_v1, %v1802_v0  ;;  %v715_v32 = vpop.f32.mrb[13].mxu1 }
 0x244   : > { %1073 = vst [vmem:[%s1804_s17 + $0x28] sm:$0xff] %v1258_v62  ;;  %1079 = vst [vmem:[%s1804_s17 + $0x58] sm:$0xff] %v1264_v63  ;;  %v716_v38 = vadd.f32 %v715_v32, %v1802_v0  ;;  %v717_v3 = vpop.f32.mrb[14].mxu1 }
 0x245   : > { %v836_v4 = vmax.f32 %v714_v2, 0.0  ;;  %v718_v5 = vadd.f32 %v717_v3, %v439_v33  ;;  %v719_v6 = vpop.f32.mrb[15].mxu1  ;;  %v479_v2 = vpop.permute.xlu0 %478 }
 0x246   : > { %v837_v7 = vmax.f32 %v716_v38, 0.0  ;;  %v720_v8 = vadd.f32 %v719_v6, %v439_v33  ;;  %v459_v34 = vpop.permute.xlu1 %458 }
 0x247   : > { %v838_v9 = vmax.f32 %v718_v5, 0.0 }
 0x248   : > { %v1265_v11 = vpack.c.bf16 %v837_v7, %v836_v4  ;;  %v839_v12 = vmax.f32 %v720_v8, 0.0 }
 0x24a   : > { %1080 = vst [vmem:[%s1804_s17 + $0x60] sm:$0xff] %v1265_v11  ;;  %v1266_v13 = vpack.c.bf16 %v839_v12, %v838_v9  ;;  %v723_v14 = vpop.f32.mrb[16].mxu1  ;;  %v464_v46 = vpop.permute.xlu1 %463 }
 0x24b   : > { %v724_v15 = vadd.f32 %v723_v14, %v444_v61  ;;  %v725_v16 = vpop.f32.mrb[17].mxu1 }
 0x24c   : > { %1081 = vst [vmem:[%s1804_s17 + $0x68] sm:$0xff] %v1266_v13  ;;  %v726_v17 = vadd.f32 %v725_v16, %v444_v61  ;;  %v727_v0 = vpop.f32.mrb[18].mxu1  ;;  %v489_v16 = vpop.permute.xlu0 %488 }
 0x24d   : > { %v840_v18 = vmax.f32 %v724_v15, 0.0  ;;  %v728_v19 = vadd.f32 %v727_v0, %v449_v10  ;;  %v729_v20 = vpop.f32.mrb[19].mxu1 }
 0x24e   : > { %v841_v22 = vmax.f32 %v726_v17, 0.0  ;;  %v730_v23 = vadd.f32 %v729_v20, %v449_v10  ;;  %v474_v60 = vpop.permute.xlu1 %473 }
 0x24f   : > { %v842_v24 = vmax.f32 %v728_v19, 0.0 }
 0x250   : > { %v1267_v25 = vpack.c.bf16 %v841_v22, %v840_v18  ;;  %v843_v26 = vmax.f32 %v730_v23, 0.0 }
 0x252   : > { %1082 = vst [vmem:[%s1804_s17 + $0x70] sm:$0xff] %v1267_v25  ;;  %v1268_v27 = vpack.c.bf16 %v843_v26, %v842_v24  ;;  %v733_v28 = vpop.f32.mrb[20].mxu1  ;;  %v484_v11 = vpop.permute.xlu1 %483 }
 0x253   : > { %v734_v29 = vadd.f32 %v733_v28, %v454_v21  ;;  %v735_v33 = vpop.f32.mrb[21].mxu1 }
 0x254   : > { %1083 = vst [vmem:[%s1804_s17 + $0x78] sm:$0xff] %v1268_v27  ;;  %v736_v35 = vadd.f32 %v735_v33, %v454_v21  ;;  %v737_v36 = vpop.f32.mrb[22].mxu1 }
 0x255   : > { %v844_v39 = vmax.f32 %v734_v29, 0.0  ;;  %v738_v40 = vadd.f32 %v737_v36, %v459_v34  ;;  %v739_v30 = vpop.f32.mrb[23].mxu1 }
 0x256   : > { %v845_v41 = vmax.f32 %v736_v35, 0.0  ;;  %v740_v42 = vadd.f32 %v739_v30, %v459_v34  ;;  %v494_v26 = vpop.permute.xlu1 %493  ;;  %v499_v34 = vpop.permute.xlu0 %498 }
 0x257   : > { %v846_v43 = vmax.f32 %v738_v40, 0.0 }
 0x258   : > { %v1269_v44 = vpack.c.bf16 %v845_v41, %v844_v39  ;;  %v847_v45 = vmax.f32 %v740_v42, 0.0 }
 0x25a   : > { %1084 = vst [vmem:[%s1804_s17 + $0x80] sm:$0xff] %v1269_v44  ;;  %v1270_v47 = vpack.c.bf16 %v847_v45, %v846_v43  ;;  %v743_v48 = vpop.f32.mrb[24].mxu1 }
 0x25b   : > { %v744_v49 = vadd.f32 %v743_v48, %v464_v46  ;;  %v745_v50 = vpop.f32.mrb[25].mxu1 }
 0x25c   : > { %1085 = vst [vmem:[%s1804_s17 + $0x88] sm:$0xff] %v1270_v47  ;;  %v746_v52 = vadd.f32 %v745_v50, %v464_v46  ;;  %v747_v53 = vpop.f32.mrb[26].mxu1  ;;  %v504_v46 = vpop.permute.xlu1 %503 }
 0x25d   : > { %v848_v54 = vmax.f32 %v744_v49, 0.0  ;;  %v748_v55 = vadd.f32 %v747_v53, %v469_v51  ;;  %v749_v31 = vpop.f32.mrb[27].mxu1 }
 0x25e   : > { %v849_v37 = vmax.f32 %v746_v52, 0.0  ;;  %v750_v56 = vadd.f32 %v749_v31, %v469_v51  ;;  %v509_v51 = vpop.permute.xlu0 %508 }
 0x25f   : > { %v850_v57 = vmax.f32 %v748_v55, 0.0 }
 0x260   : > { %v1271_v58 = vpack.c.bf16 %v849_v37, %v848_v54  ;;  %v851_v59 = vmax.f32 %v750_v56, 0.0 }
 0x262   : > { %1086 = vst [vmem:[%s1804_s17 + $0x90] sm:$0xff] %v1271_v58  ;;  %v1272_v61 = vpack.c.bf16 %v851_v59, %v850_v57  ;;  %v753_v62 = vpop.f32.mrb[28].mxu1 }
 0x263   : > { %v754_v63 = vadd.f32 %v753_v62, %v474_v60  ;;  %v755_v1 = vpop.f32.mrb[29].mxu1 }
 0x264   : > { %1087 = vst [vmem:[%s1804_s17 + $0x98] sm:$0xff] %v1272_v61  ;;  %v756_v32 = vadd.f32 %v755_v1, %v474_v60  ;;  %v757_v38 = vpop.f32.mrb[30].mxu1  ;;  %v514_v60 = vpop.permute.xlu1 %513 }
 0x265   : > { %v852_v3 = vmax.f32 %v754_v63, 0.0  ;;  %v758_v4 = vadd.f32 %v757_v38, %v479_v2  ;;  %v759_v5 = vpop.f32.mrb[31].mxu1 }
 0x266   : > { %v853_v6 = vmax.f32 %v756_v32, 0.0  ;;  %v760_v7 = vadd.f32 %v759_v5, %v479_v2  ;;  %v519_v2 = vpop.permute.xlu0 %518 }
 0x267   : > { %v854_v8 = vmax.f32 %v758_v4, 0.0 }
 0x268   : > { %v1273_v9 = vpack.c.bf16 %v853_v6, %v852_v3  ;;  %v855_v10 = vmax.f32 %v760_v7, 0.0 }
 0x26a   : > { %1088 = vst [vmem:[%s1804_s17 + $0xa0] sm:$0xff] %v1273_v9  ;;  %v1274_v12 = vpack.c.bf16 %v855_v10, %v854_v8  ;;  %v763_v13 = vpop.f32.mrb[32].mxu1 }
 0x26b   : > { %v764_v14 = vadd.f32 %v763_v13, %v484_v11  ;;  %v765_v15 = vpop.f32.mrb[33].mxu1 }
 0x26c   : > { %1089 = vst [vmem:[%s1804_s17 + $0xa8] sm:$0xff] %v1274_v12  ;;  %v766_v17 = vadd.f32 %v765_v15, %v484_v11  ;;  %v767_v0 = vpop.f32.mrb[34].mxu1  ;;  %v524_v11 = vpop.permute.xlu1 %523 }
 0x26d   : > { %v856_v18 = vmax.f32 %v764_v14, 0.0  ;;  %v768_v19 = vadd.f32 %v767_v0, %v489_v16  ;;  %v769_v20 = vpop.f32.mrb[35].mxu1 }
 0x26e   : > { %v857_v21 = vmax.f32 %v766_v17, 0.0  ;;  %v770_v22 = vadd.f32 %v769_v20, %v489_v16  ;;  %v529_v16 = vpop.permute.xlu0 %528 }
 0x26f   : > { %v858_v23 = vmax.f32 %v768_v19, 0.0 }
 0x270   : > { %v1275_v24 = vpack.c.bf16 %v857_v21, %v856_v18  ;;  %v859_v25 = vmax.f32 %v770_v22, 0.0 }
 0x272   : > { %1090 = vst [vmem:[%s1804_s17 + $0xb0] sm:$0xff] %v1275_v24  ;;  %v1276_v27 = vpack.c.bf16 %v859_v25, %v858_v23  ;;  %v773_v28 = vpop.f32.mrb[36].mxu1 }
 0x273   : > { %v774_v29 = vadd.f32 %v773_v28, %v494_v26  ;;  %v775_v33 = vpop.f32.mrb[37].mxu1 }
 0x274   : > { %1091 = vst [vmem:[%s1804_s17 + $0xb8] sm:$0xff] %v1276_v27  ;;  %v776_v35 = vadd.f32 %v775_v33, %v494_v26  ;;  %v777_v36 = vpop.f32.mrb[38].mxu1 }
 0x275   : > { %v860_v39 = vmax.f32 %v774_v29, 0.0  ;;  %v778_v40 = vadd.f32 %v777_v36, %v499_v34  ;;  %v779_v30 = vpop.f32.mrb[39].mxu1 }
 0x276   : > { %v861_v41 = vmax.f32 %v776_v35, 0.0  ;;  %v780_v42 = vadd.f32 %v779_v30, %v499_v34 }
 0x277   : > { %v862_v43 = vmax.f32 %v778_v40, 0.0 }
 0x278   : > { %v1277_v44 = vpack.c.bf16 %v861_v41, %v860_v39  ;;  %v863_v45 = vmax.f32 %v780_v42, 0.0 }
 0x27a   : > { %1092 = vst [vmem:[%s1804_s17 + $0xc0] sm:$0xff] %v1277_v44  ;;  %v1278_v47 = vpack.c.bf16 %v863_v45, %v862_v43  ;;  %v783_v48 = vpop.f32.mrb[40].mxu1 }
 0x27b   : > { %v784_v49 = vadd.f32 %v783_v48, %v504_v46  ;;  %v785_v50 = vpop.f32.mrb[41].mxu1 }
 0x27c   : > { %1093 = vst [vmem:[%s1804_s17 + $0xc8] sm:$0xff] %v1278_v47  ;;  %v786_v52 = vadd.f32 %v785_v50, %v504_v46  ;;  %v787_v53 = vpop.f32.mrb[42].mxu1 }
 0x27d   : > { %v864_v54 = vmax.f32 %v784_v49, 0.0  ;;  %v788_v55 = vadd.f32 %v787_v53, %v509_v51  ;;  %v789_v31 = vpop.f32.mrb[43].mxu1 }
 0x27e   : > { %v865_v37 = vmax.f32 %v786_v52, 0.0  ;;  %v790_v56 = vadd.f32 %v789_v31, %v509_v51 }
 0x27f   : > { %v866_v57 = vmax.f32 %v788_v55, 0.0 }
 0x280   : > { %v1279_v58 = vpack.c.bf16 %v865_v37, %v864_v54  ;;  %v867_v59 = vmax.f32 %v790_v56, 0.0 }
 0x282   : > { %1094 = vst [vmem:[%s1804_s17 + $0xd0] sm:$0xff] %v1279_v58  ;;  %v1280_v61 = vpack.c.bf16 %v867_v59, %v866_v57  ;;  %v793_v62 = vpop.f32.mrb[44].mxu1 }
 0x283   : > { %v794_v63 = vadd.f32 %v793_v62, %v514_v60  ;;  %v795_v1 = vpop.f32.mrb[45].mxu1 }
 0x284   : > { %1095 = vst [vmem:[%s1804_s17 + $0xd8] sm:$0xff] %v1280_v61  ;;  %v796_v32 = vadd.f32 %v795_v1, %v514_v60  ;;  %v797_v38 = vpop.f32.mrb[46].mxu1 }
 0x285   : > { %v868_v3 = vmax.f32 %v794_v63, 0.0  ;;  %v798_v4 = vadd.f32 %v797_v38, %v519_v2  ;;  %v799_v5 = vpop.f32.mrb[47].mxu1 }
 0x286   : > { %v869_v6 = vmax.f32 %v796_v32, 0.0  ;;  %v800_v7 = vadd.f32 %v799_v5, %v519_v2 }
 0x287   : > { %v870_v8 = vmax.f32 %v798_v4, 0.0 }
 0x288   : > { %v1281_v9 = vpack.c.bf16 %v869_v6, %v868_v3  ;;  %v871_v10 = vmax.f32 %v800_v7, 0.0 }
 0x28a   : > { %1096 = vst [vmem:[%s1804_s17 + $0xe0] sm:$0xff] %v1281_v9  ;;  %v1282_v12 = vpack.c.bf16 %v871_v10, %v870_v8  ;;  %v803_v13 = vpop.f32.mrb[48].mxu1 }
 0x28b   : > { %v804_v14 = vadd.f32 %v803_v13, %v524_v11  ;;  %v805_v15 = vpop.f32.mrb[49].mxu1 }
 0x28c   : > { %1097 = vst [vmem:[%s1804_s17 + $0xe8] sm:$0xff] %v1282_v12  ;;  %v806_v17 = vadd.f32 %v805_v15, %v524_v11  ;;  %v807_v0 = vpop.f32.mrb[50].mxu1 }
 0x28d   : > { %v872_v18 = vmax.f32 %v804_v14, 0.0  ;;  %v808_v19 = vadd.f32 %v807_v0, %v529_v16  ;;  %v809_v20 = vpop.f32.mrb[51].mxu1 }
 0x28e   : > { %v873_v21 = vmax.f32 %v806_v17, 0.0  ;;  %v810_v22 = vadd.f32 %v809_v20, %v529_v16 }
 0x28f   : > { %v874_v23 = vmax.f32 %v808_v19, 0.0 }
 0x290   : > { %v1283_v24 = vpack.c.bf16 %v873_v21, %v872_v18  ;;  %v875_v25 = vmax.f32 %v810_v22, 0.0 }
 0x292   : > { %1098 = vst [vmem:[%s1804_s17 + $0xf0] sm:$0xff] %v1283_v24  ;;  %v1284_v26 = vpack.c.bf16 %v875_v25, %v874_v23 }
 0x294   : > { %1099 = vst [vmem:[%s1804_s17 + $0xf8] sm:$0xff] %v1284_v26 }
 0x295   : > { %1388 = shalt.err (!%p1385_p3)
}
 0x296   : > { %s1389_s27 = scalar_lea.hbm %s1851_s8, 4096  ;;  %s1393_s30 = scalar_lea.hbm %s1902_s3, 8192 }
 0x297   : > { %p1390_p5 = scmp.ne.s32.totalorder %s1851_s8, %s1389_s27  ;;  %p1394_p9 = scmp.lt.u32.totalorder %s1851_s8, %s1902_s3 }
 0x298   : > { %p1395_p0 = scmp.lt.u32.totalorder %s1393_s30, %s1389_s27  ;;  %p1397_p6 = scmp.lt.u32.totalorder %s1389_s27, %s1851_s8 }
 0x299   : > { %p1391_p7 = pnand %p1390_p5, %p1910_p11 }
 0x29a   : > { %p1396_p2 = por %p1395_p0, %p1394_p9 }
 0x29b   : > { %p1392_p8 = pneg %p1391_p7 }
 0x29c   : > { %p1398_p12 = por %p1397_p6, %p1396_p2 }
 0x29e   : > { %p1399_p13 = pnand %p1398_p12, %p1392_p8 }
 0x2a0   : > { %1402 = shalt.err (!%p1399_p13)
}
 0x2a1   : > { %s1449_s11 = smov 128   ;;  %s1450_s17 = smov 256  }
 0x2a2   : > { %s1451_s23 = smov 8  }
 0x2a3   : > { %1290 = dma.vmem_to_hbm [thread:$0]  (%p1910_p11), %s1853_s4, 4096, %s1851_s8, %s1101_s16, %s1449_s11, %s1450_s17, %s1451_s23  }
 0x2a4 PF: > { %s1129_s6 = sand.u32 1, %s1429_s12   ;;  %p1911_p4 = scmp.ne.s32.totalorder %s1907_s25, 0 }
 0x2a5   : > { %p1912_p10 = scmp.ge.s32.totalorder %s1441_s15, 2  ;;  %s1130_s7 = scalar_lea.sflag [#allocation4], %s1129_s6 }
 0x2a7   : > { %p1297_p1 = pnand %p1912_p10, %p1911_p4 }
 0x2a9   : > { %1424 = dma.done.wait (!%p1297_p1), %s1130_s7, 4096  }
 0x2aa   : > { %1426 = vsyncadd (!%p1297_p1), %s1130_s7, 4294963200  ;;  %p16_p3 = scmp.ge.s32.totalorder %s1497_s18, 4   ;;  %s1913_s12 = smov %s1433_s13 }
 0x2ab   : > { %s1914_s13 = smov %s1437_s14  ;;  %s1915_s14 = smov %s1509_s21 }
 0x2ac   : > { %s1916_s15 = smov %s1497_s18  ;;  %18 = sbr.rel (!%p16_p3) target bundleno = 5 (0x5), region = 77 }
 0x2b3   :  { %1135 = vsyncpa [#allocation3], 1 }
 0x2b4   :  { %1137 = vsyncpa [#allocation3 + $0x1], 1 }
 0x2b5   :  { %1138 = vsyncpa [#allocation4], 1 }
 0x2b6   :  { %1140 = vsyncpa [#allocation4 + $0x1], 1 }

</bundles_post_ra>
